<compile_context>
chip_gen: v6e
topology: v6e:2x2x1
jax: 0.10.0
libtpu: 0.0.40
codegen_flags: <defaults>
</compile_context>

<pallas_src>
import jax
import jax.numpy as jnp
from jax import lax
from jax.experimental import pallas as pl
from jax.experimental.pallas import tpu as pltpu


def lstm_kernel(x_ref, p_ref, out_ref):
    # x_ref:  (T*B, D)  time-major rows, batch padded to a multiple of 8
    # p_ref:  (P, 4H)   packed params:
    #           rows [0:D)           W_ih^T        (g columns pre-scaled by 2)
    #           rows [R_HH:R_HH+H)   W_hh^T        (g columns pre-scaled by 2)
    #           row  R_B             b_ih + b_hh   (g columns pre-scaled by 2)
    #           row  R_FC            lanes [0:H) = fc_w, lane H = fc_b
    # out_ref: (B, 1)
    TB, D = x_ref.shape
    H = p_ref.shape[1] // 4
    B = out_ref.shape[0]
    T = TB // B
    R_HH = ((D + 7) // 8) * 8
    R_B = R_HH + H
    R_FC = R_B + 1

    w_ih = p_ref[0:D, :]                 # (D, 4H)
    w_hh = p_ref[R_HH:R_HH + H, :]       # (H, 4H)  loaded once, reused each step
    bias = p_ref[R_B:R_B + 1, :]         # (1, 4H)
    fc_row = p_ref[R_FC:R_FC + 1, :]     # (1, 4H)

    # Input projection + bias for ALL timesteps in one matmul (off the serial path).
    x_proj = jnp.dot(x_ref[...], w_ih, preferred_element_type=jnp.float32) + bias

    # Lane mask selecting the g-gate quarter (hoisted: JAX does not CSE broadcasts).
    lane = lax.broadcasted_iota(jnp.int32, (B, 4 * H), 1)
    is_g = (lane >= 2 * H) & (lane < 3 * H)

    h = jnp.zeros((B, H), jnp.float32)
    c_full = jnp.zeros((B, 4 * H), jnp.float32)   # valid state lives in lanes [0:H)

    # Fully-unrolled recurrence (T small & static).  Only h @ W_hh + the gate
    # math sits on the serial critical path; the x_proj slice is a static,
    # sublane-aligned 8-row slice.
    for t in range(T):
        gates = x_proj[t * B:(t + 1) * B, :] + jnp.dot(
            h, w_hh, preferred_element_type=jnp.float32)        # (B, 4H), one vreg
        s = jax.nn.sigmoid(gates)                  # single full-vreg EUP chain
        # g columns were pre-scaled by 2, so tanh(z) == 2*sigmoid(2z) - 1 exactly.
        acts = jnp.where(is_g, 2.0 * s - 1.0, s)   # lanes: [ i | f | g(=tanh) | o ]
        f_al = pltpu.roll(acts, 3 * H, 1)          # f -> lanes [0:H)   (XLU)
        g_al = pltpu.roll(acts, 2 * H, 1)          # g -> lanes [0:H)   (XLU)
        o_al = pltpu.roll(acts, 1 * H, 1)          # o -> lanes [0:H)   (XLU)
        c_full = f_al * c_full + acts * g_al       # full-vreg VPU; lanes >= H are junk
        h = o_al[:, :H] * jnp.tanh(c_full[:, :H])  # tanh over H lanes only

    # Final FC as VPU mul + XLU lane reduction (no N=1 MXU matmul in the epilogue).
    out_ref[...] = (jnp.sum(h * fc_row[:, :H], axis=-1, keepdims=True)
                    + fc_row[:, H:H + 1])


def _lstm_model_forward(x_btd, w_ih, w_hh, b_ih, b_hh, fc_w, fc_b):
    """x_btd: (B, T, D) float32 (batch_first, like PyTorch). Returns (B, 1)."""
    B, T, D = x_btd.shape
    H = w_hh.shape[1]                    # PyTorch weight_hh_l0 is (4H, H)

    # Pad batch to the 8-sublane granularity so vregs / MXU rows are not wasted.
    B_pad = max(8, ((B + 7) // 8) * 8)

    # v7x scaling guard: the fully-resident design keeps x + x_proj in VMEM.
    resident_bytes = 4 * (T * B_pad * (D + 4 * H))
    assert resident_bytes < 16 * 1024 * 1024, (
        "T*B too large for the fully-resident kernel; switch to a T-chunked grid "
        "('arbitrary' reduction axis, h/c carried in VMEM scratch via pl.when).")

    # Pre-scale the g-gate columns by 2 so tanh(z) = 2*sigmoid(2z) - 1 can be
    # recovered from a single full-vreg sigmoid inside the kernel.
    g_scale = jnp.ones((4 * H,), jnp.float32).at[2 * H:3 * H].set(2.0)

    w_ih_k = w_ih.T.astype(jnp.float32) * g_scale               # (D, 4H)
    w_hh_k = w_hh.T.astype(jnp.float32) * g_scale               # (H, 4H)
    b_k = (b_ih + b_hh).astype(jnp.float32) * g_scale           # (4H,)

    R_HH = ((D + 7) // 8) * 8
    R_B = R_HH + H
    R_FC = R_B + 1
    P = ((R_FC + 1 + 7) // 8) * 8

    fc_row = jnp.zeros((4 * H,), jnp.float32)
    fc_row = fc_row.at[:H].set(fc_w.reshape(-1).astype(jnp.float32))
    fc_row = fc_row.at[H].set(fc_b.reshape(())[()].astype(jnp.float32))

    params = jnp.zeros((P, 4 * H), jnp.float32)
    params = params.at[0:D, :].set(w_ih_k)
    params = params.at[R_HH:R_HH + H, :].set(w_hh_k)
    params = params.at[R_B, :].set(b_k)
    params = params.at[R_FC, :].set(fc_row)

    # Time-major, batch-padded, flattened input rows.
    x_tbd = jnp.transpose(x_btd, (1, 0, 2)).astype(jnp.float32)      # (T, B, D)
    x_tbd = jnp.pad(x_tbd, ((0, 0), (0, B_pad - B), (0, 0)))         # (T, B_pad, D)
    x_flat = x_tbd.reshape(T * B_pad, D)

    out_pad = pl.pallas_call(
        lstm_kernel,
        out_shape=jax.ShapeDtypeStruct((B_pad, 1), jnp.float32),
        grid_spec=pltpu.PrefetchScalarGridSpec(
            num_scalar_prefetch=0,
            grid=(1,),                                               # single invocation
            in_specs=[
                pl.BlockSpec((T * B_pad, D), lambda i: (0, 0)),      # x, fully resident
                pl.BlockSpec((P, 4 * H), lambda i: (0, 0)),          # packed params
            ],
            out_specs=pl.BlockSpec((B_pad, 1), lambda i: (0, 0)),
        ),
        compiler_params=pltpu.CompilerParams(
            dimension_semantics=("arbitrary",)),
    )(x_flat, params)

    return out_pad[:B]


# jit the wrapper so preprocessing (transpose/pad/scale/pack) and the out[:B]
# slice fuse with the caller instead of running as tiny separate HLOs.
lstm_model_forward = jax.jit(_lstm_model_forward)


def lstm_model_reference(x_btd, w_ih, w_hh, b_ih, b_hh, fc_w, fc_b):
    """Pure-JAX reference mirroring PyTorch nn.LSTM + nn.Linear semantics."""
    B, T, D = x_btd.shape
    H = w_hh.shape[1]

    def step(carry, x_t):
        h, c = carry
        gates = x_t @ w_ih.T + h @ w_hh.T + b_ih + b_hh
        i = jax.nn.sigmoid(gates[:, 0 * H:1 * H])
        f = jax.nn.sigmoid(gates[:, 1 * H:2 * H])
        g = jnp.tanh(gates[:, 2 * H:3 * H])
        o = jax.nn.sigmoid(gates[:, 3 * H:4 * H])
        c = f * c + i * g
        h = o * jnp.tanh(c)
        return (h, c), h

    h0 = jnp.zeros((B, H), jnp.float32)
    c0 = jnp.zeros((B, H), jnp.float32)
    (h_last, _), _ = lax.scan(step, (h0, c0), jnp.transpose(x_btd, (1, 0, 2)))
    return h_last @ fc_w.T + fc_b


if __name__ == "__main__":
    # Small shapes consistent with the module: batch=2, seq=8, input_dim=4, hidden=32.
    B, T, D, H = 2, 8, 4, 32

    key = jax.random.PRNGKey(0)
    ks = jax.random.split(key, 7)
    bound = 1.0 / (H ** 0.5)

    # PyTorch-shaped parameters, deterministic uniform init (like nn.LSTM default).
    w_ih = jax.random.uniform(ks[0], (4 * H, D), jnp.float32, -bound, bound)
    w_hh = jax.random.uniform(ks[1], (4 * H, H), jnp.float32, -bound, bound)
    b_ih = jax.random.uniform(ks[2], (4 * H,), jnp.float32, -bound, bound)
    b_hh = jax.random.uniform(ks[3], (4 * H,), jnp.float32, -bound, bound)
    fc_w = jax.random.uniform(ks[4], (1, H), jnp.float32, -bound, bound)
    fc_b = jax.random.uniform(ks[5], (1,), jnp.float32, -bound, bound)

    x = jax.random.normal(ks[6], (B, T, D), jnp.float32)

    out = lstm_model_forward(x, w_ih, w_hh, b_ih, b_hh, fc_w, fc_b)
    out = jax.block_until_ready(out)

    ref = lstm_model_reference(x, w_ih, w_hh, b_ih, b_hh, fc_w, fc_b)
    assert out.shape == (B, 1)
    assert jnp.allclose(out, ref, atol=1e-5, rtol=1e-5), (out, ref)

    print("KERNEL_OK")
</pallas_src>

<mosaic_0001>
module attributes {stable_mosaic.version = 11 : i64} {
  func.func @lstm_kernel(%arg0: i32, %arg1: memref<64x4xf32, #tpu.memory_space<vmem>>, %arg2: memref<48x128xf32, #tpu.memory_space<vmem>>, %arg3: memref<8x1xf32, #tpu.memory_space<vmem>>) attributes {dimension_semantics = [#tpu.dimension_semantics<arbitrary>], iteration_bounds = array<i64: 1>, scalar_prefetch = 0 : i64, scratch_operands = 0 : i64, tpu.core_type = #tpu.core_type<tc>, window_params = [{pipeline_mode = #tpu.pipeline_mode<synchronous>, transform_indices = @transform_0, window_bounds = array<i64: 64, 4>}, {pipeline_mode = #tpu.pipeline_mode<synchronous>, transform_indices = @transform_1, window_bounds = array<i64: 48, 128>}, {pipeline_mode = #tpu.pipeline_mode<synchronous>, transform_indices = @transform_2, window_bounds = array<i64: 8, 1>}]} {
    %c0 = arith.constant 0 : index
    %c0_0 = arith.constant 0 : index
    %0 = vector.load %arg2[%c0, %c0_0] : memref<48x128xf32, #tpu.memory_space<vmem>>, vector<4x128xf32>
    %c8 = arith.constant 8 : index
    %c0_1 = arith.constant 0 : index
    %1 = vector.load %arg2[%c8, %c0_1] : memref<48x128xf32, #tpu.memory_space<vmem>>, vector<32x128xf32>
    %c40 = arith.constant 40 : index
    %c0_2 = arith.constant 0 : index
    %2 = vector.load %arg2[%c40, %c0_2] : memref<48x128xf32, #tpu.memory_space<vmem>>, vector<1x128xf32>
    %c41 = arith.constant 41 : index
    %c0_3 = arith.constant 0 : index
    %3 = vector.load %arg2[%c41, %c0_3] : memref<48x128xf32, #tpu.memory_space<vmem>>, vector<1x128xf32>
    %c0_4 = arith.constant 0 : index
    %c0_5 = arith.constant 0 : index
    %4 = vector.load %arg1[%c0_4, %c0_5] : memref<64x4xf32, #tpu.memory_space<vmem>>, vector<64x4xf32>
    %cst = arith.constant dense<0.000000e+00> : vector<64x128xf32>
    %5 = tpu.matmul %4, %0, %cst {dimension_numbers = #tpu.dot_dimension_numbers<[1], [0], [0], [1], [0, 0, 1, 1], [], []>} : vector<64x4xf32>, vector<4x128xf32>, vector<64x128xf32> -> vector<64x128xf32>
    %6 = vector.broadcast %2 : vector<1x128xf32> to vector<64x128xf32>
    %7 = arith.addf %5, %6 : vector<64x128xf32>
    %8 = tpu.iota {dimensions = array<i32: 1>} : vector<8x128xi32>
    %c64_i32 = arith.constant 64 : i32
    %9 = vector.broadcast %c64_i32 : i32 to vector<8x128xi32>
    %10 = arith.cmpi sge, %8, %9 : vector<8x128xi32>
    %c96_i32 = arith.constant 96 : i32
    %11 = vector.broadcast %c96_i32 : i32 to vector<8x128xi32>
    %12 = arith.cmpi slt, %8, %11 : vector<8x128xi32>
    %13 = arith.andi %10, %12 : vector<8x128xi1>
    %cst_6 = arith.constant 0.000000e+00 : f32
    %14 = vector.broadcast %cst_6 : f32 to vector<8x32xf32>
    %cst_7 = arith.constant 0.000000e+00 : f32
    %15 = vector.broadcast %cst_7 : f32 to vector<8x128xf32>
    %16 = vector.extract_strided_slice %7 {offsets = [0, 0], sizes = [8, 128], strides = [1, 1]} : vector<64x128xf32> to vector<8x128xf32>
    %cst_8 = arith.constant dense<0.000000e+00> : vector<8x128xf32>
    %17 = tpu.matmul %14, %1, %cst_8 {dimension_numbers = #tpu.dot_dimension_numbers<[1], [0], [0], [1], [0, 0, 1, 1], [], []>} : vector<8x32xf32>, vector<32x128xf32>, vector<8x128xf32> -> vector<8x128xf32>
    %18 = arith.addf %16, %17 : vector<8x128xf32>
    %19 = arith.negf %18 : vector<8x128xf32>
    %20 = math.exp %19 : vector<8x128xf32>
    %cst_9 = arith.constant 1.000000e+00 : f32
    %21 = vector.broadcast %cst_9 : f32 to vector<8x128xf32>
    %22 = arith.addf %21, %20 : vector<8x128xf32>
    %23 = arith.divf %21, %22 : vector<8x128xf32>
    %cst_10 = arith.constant 2.000000e+00 : f32
    %24 = vector.broadcast %cst_10 : f32 to vector<8x128xf32>
    %25 = arith.mulf %24, %23 : vector<8x128xf32>
    %cst_11 = arith.constant 1.000000e+00 : f32
    %26 = vector.broadcast %cst_11 : f32 to vector<8x128xf32>
    %27 = arith.subf %25, %26 : vector<8x128xf32>
    %28 = arith.select %13, %27, %23 : vector<8x128xi1>, vector<8x128xf32>
    %c96_i32_12 = arith.constant 96 : i32
    %29 = tpu.dynamic_rotate %28 by %c96_i32_12 dim 1 : vector<8x128xf32>, i32 -> vector<8x128xf32>
    %c64_i32_13 = arith.constant 64 : i32
    %30 = tpu.dynamic_rotate %28 by %c64_i32_13 dim 1 : vector<8x128xf32>, i32 -> vector<8x128xf32>
    %c32_i32 = arith.constant 32 : i32
    %31 = tpu.dynamic_rotate %28 by %c32_i32 dim 1 : vector<8x128xf32>, i32 -> vector<8x128xf32>
    %32 = arith.mulf %29, %15 : vector<8x128xf32>
    %33 = arith.mulf %28, %30 : vector<8x128xf32>
    %34 = arith.addf %32, %33 : vector<8x128xf32>
    %35 = vector.extract_strided_slice %31 {offsets = [0, 0], sizes = [8, 32], strides = [1, 1]} : vector<8x128xf32> to vector<8x32xf32>
    %36 = vector.extract_strided_slice %34 {offsets = [0, 0], sizes = [8, 32], strides = [1, 1]} : vector<8x128xf32> to vector<8x32xf32>
    %37 = math.tanh %36 : vector<8x32xf32>
    %38 = arith.mulf %35, %37 : vector<8x32xf32>
    %39 = vector.extract_strided_slice %7 {offsets = [8, 0], sizes = [8, 128], strides = [1, 1]} : vector<64x128xf32> to vector<8x128xf32>
    %cst_14 = arith.constant dense<0.000000e+00> : vector<8x128xf32>
    %40 = tpu.matmul %38, %1, %cst_14 {dimension_numbers = #tpu.dot_dimension_numbers<[1], [0], [0], [1], [0, 0, 1, 1], [], []>} : vector<8x32xf32>, vector<32x128xf32>, vector<8x128xf32> -> vector<8x128xf32>
    %41 = arith.addf %39, %40 : vector<8x128xf32>
    %42 = arith.negf %41 : vector<8x128xf32>
    %43 = math.exp %42 : vector<8x128xf32>
    %cst_15 = arith.constant 1.000000e+00 : f32
    %44 = vector.broadcast %cst_15 : f32 to vector<8x128xf32>
    %45 = arith.addf %44, %43 : vector<8x128xf32>
    %46 = arith.divf %44, %45 : vector<8x128xf32>
    %cst_16 = arith.constant 2.000000e+00 : f32
    %47 = vector.broadcast %cst_16 : f32 to vector<8x128xf32>
    %48 = arith.mulf %47, %46 : vector<8x128xf32>
    %cst_17 = arith.constant 1.000000e+00 : f32
    %49 = vector.broadcast %cst_17 : f32 to vector<8x128xf32>
    %50 = arith.subf %48, %49 : vector<8x128xf32>
    %51 = arith.select %13, %50, %46 : vector<8x128xi1>, vector<8x128xf32>
    %c96_i32_18 = arith.constant 96 : i32
    %52 = tpu.dynamic_rotate %51 by %c96_i32_18 dim 1 : vector<8x128xf32>, i32 -> vector<8x128xf32>
    %c64_i32_19 = arith.constant 64 : i32
    %53 = tpu.dynamic_rotate %51 by %c64_i32_19 dim 1 : vector<8x128xf32>, i32 -> vector<8x128xf32>
    %c32_i32_20 = arith.constant 32 : i32
    %54 = tpu.dynamic_rotate %51 by %c32_i32_20 dim 1 : vector<8x128xf32>, i32 -> vector<8x128xf32>
    %55 = arith.mulf %52, %34 : vector<8x128xf32>
    %56 = arith.mulf %51, %53 : vector<8x128xf32>
    %57 = arith.addf %55, %56 : vector<8x128xf32>
    %58 = vector.extract_strided_slice %54 {offsets = [0, 0], sizes = [8, 32], strides = [1, 1]} : vector<8x128xf32> to vector<8x32xf32>
    %59 = vector.extract_strided_slice %57 {offsets = [0, 0], sizes = [8, 32], strides = [1, 1]} : vector<8x128xf32> to vector<8x32xf32>
    %60 = math.tanh %59 : vector<8x32xf32>
    %61 = arith.mulf %58, %60 : vector<8x32xf32>
    %62 = vector.extract_strided_slice %7 {offsets = [16, 0], sizes = [8, 128], strides = [1, 1]} : vector<64x128xf32> to vector<8x128xf32>
    %cst_21 = arith.constant dense<0.000000e+00> : vector<8x128xf32>
    %63 = tpu.matmul %61, %1, %cst_21 {dimension_numbers = #tpu.dot_dimension_numbers<[1], [0], [0], [1], [0, 0, 1, 1], [], []>} : vector<8x32xf32>, vector<32x128xf32>, vector<8x128xf32> -> vector<8x128xf32>
    %64 = arith.addf %62, %63 : vector<8x128xf32>
    %65 = arith.negf %64 : vector<8x128xf32>
    %66 = math.exp %65 : vector<8x128xf32>
    %cst_22 = arith.constant 1.000000e+00 : f32
    %67 = vector.broadcast %cst_22 : f32 to vector<8x128xf32>
    %68 = arith.addf %67, %66 : vector<8x128xf32>
    %69 = arith.divf %67, %68 : vector<8x128xf32>
    %cst_23 = arith.constant 2.000000e+00 : f32
    %70 = vector.broadcast %cst_23 : f32 to vector<8x128xf32>
    %71 = arith.mulf %70, %69 : vector<8x128xf32>
    %cst_24 = arith.constant 1.000000e+00 : f32
    %72 = vector.broadcast %cst_24 : f32 to vector<8x128xf32>
    %73 = arith.subf %71, %72 : vector<8x128xf32>
    %74 = arith.select %13, %73, %69 : vector<8x128xi1>, vector<8x128xf32>
    %c96_i32_25 = arith.constant 96 : i32
    %75 = tpu.dynamic_rotate %74 by %c96_i32_25 dim 1 : vector<8x128xf32>, i32 -> vector<8x128xf32>
    %c64_i32_26 = arith.constant 64 : i32
    %76 = tpu.dynamic_rotate %74 by %c64_i32_26 dim 1 : vector<8x128xf32>, i32 -> vector<8x128xf32>
    %c32_i32_27 = arith.constant 32 : i32
    %77 = tpu.dynamic_rotate %74 by %c32_i32_27 dim 1 : vector<8x128xf32>, i32 -> vector<8x128xf32>
    %78 = arith.mulf %75, %57 : vector<8x128xf32>
    %79 = arith.mulf %74, %76 : vector<8x128xf32>
    %80 = arith.addf %78, %79 : vector<8x128xf32>
    %81 = vector.extract_strided_slice %77 {offsets = [0, 0], sizes = [8, 32], strides = [1, 1]} : vector<8x128xf32> to vector<8x32xf32>
    %82 = vector.extract_strided_slice %80 {offsets = [0, 0], sizes = [8, 32], strides = [1, 1]} : vector<8x128xf32> to vector<8x32xf32>
    %83 = math.tanh %82 : vector<8x32xf32>
    %84 = arith.mulf %81, %83 : vector<8x32xf32>
    %85 = vector.extract_strided_slice %7 {offsets = [24, 0], sizes = [8, 128], strides = [1, 1]} : vector<64x128xf32> to vector<8x128xf32>
    %cst_28 = arith.constant dense<0.000000e+00> : vector<8x128xf32>
    %86 = tpu.matmul %84, %1, %cst_28 {dimension_numbers = #tpu.dot_dimension_numbers<[1], [0], [0], [1], [0, 0, 1, 1], [], []>} : vector<8x32xf32>, vector<32x128xf32>, vector<8x128xf32> -> vector<8x128xf32>
    %87 = arith.addf %85, %86 : vector<8x128xf32>
    %88 = arith.negf %87 : vector<8x128xf32>
    %89 = math.exp %88 : vector<8x128xf32>
    %cst_29 = arith.constant 1.000000e+00 : f32
    %90 = vector.broadcast %cst_29 : f32 to vector<8x128xf32>
    %91 = arith.addf %90, %89 : vector<8x128xf32>
    %92 = arith.divf %90, %91 : vector<8x128xf32>
    %cst_30 = arith.constant 2.000000e+00 : f32
    %93 = vector.broadcast %cst_30 : f32 to vector<8x128xf32>
    %94 = arith.mulf %93, %92 : vector<8x128xf32>
    %cst_31 = arith.constant 1.000000e+00 : f32
    %95 = vector.broadcast %cst_31 : f32 to vector<8x128xf32>
    %96 = arith.subf %94, %95 : vector<8x128xf32>
    %97 = arith.select %13, %96, %92 : vector<8x128xi1>, vector<8x128xf32>
    %c96_i32_32 = arith.constant 96 : i32
    %98 = tpu.dynamic_rotate %97 by %c96_i32_32 dim 1 : vector<8x128xf32>, i32 -> vector<8x128xf32>
    %c64_i32_33 = arith.constant 64 : i32
    %99 = tpu.dynamic_rotate %97 by %c64_i32_33 dim 1 : vector<8x128xf32>, i32 -> vector<8x128xf32>
    %c32_i32_34 = arith.constant 32 : i32
    %100 = tpu.dynamic_rotate %97 by %c32_i32_34 dim 1 : vector<8x128xf32>, i32 -> vector<8x128xf32>
    %101 = arith.mulf %98, %80 : vector<8x128xf32>
    %102 = arith.mulf %97, %99 : vector<8x128xf32>
    %103 = arith.addf %101, %102 : vector<8x128xf32>
    %104 = vector.extract_strided_slice %100 {offsets = [0, 0], sizes = [8, 32], strides = [1, 1]} : vector<8x128xf32> to vector<8x32xf32>
    %105 = vector.extract_strided_slice %103 {offsets = [0, 0], sizes = [8, 32], strides = [1, 1]} : vector<8x128xf32> to vector<8x32xf32>
    %106 = math.tanh %105 : vector<8x32xf32>
    %107 = arith.mulf %104, %106 : vector<8x32xf32>
    %108 = vector.extract_strided_slice %7 {offsets = [32, 0], sizes = [8, 128], strides = [1, 1]} : vector<64x128xf32> to vector<8x128xf32>
    %cst_35 = arith.constant dense<0.000000e+00> : vector<8x128xf32>
    %109 = tpu.matmul %107, %1, %cst_35 {dimension_numbers = #tpu.dot_dimension_numbers<[1], [0], [0], [1], [0, 0, 1, 1], [], []>} : vector<8x32xf32>, vector<32x128xf32>, vector<8x128xf32> -> vector<8x128xf32>
    %110 = arith.addf %108, %109 : vector<8x128xf32>
    %111 = arith.negf %110 : vector<8x128xf32>
    %112 = math.exp %111 : vector<8x128xf32>
    %cst_36 = arith.constant 1.000000e+00 : f32
    %113 = vector.broadcast %cst_36 : f32 to vector<8x128xf32>
    %114 = arith.addf %113, %112 : vector<8x128xf32>
    %115 = arith.divf %113, %114 : vector<8x128xf32>
    %cst_37 = arith.constant 2.000000e+00 : f32
    %116 = vector.broadcast %cst_37 : f32 to vector<8x128xf32>
    %117 = arith.mulf %116, %115 : vector<8x128xf32>
    %cst_38 = arith.constant 1.000000e+00 : f32
    %118 = vector.broadcast %cst_38 : f32 to vector<8x128xf32>
    %119 = arith.subf %117, %118 : vector<8x128xf32>
    %120 = arith.select %13, %119, %115 : vector<8x128xi1>, vector<8x128xf32>
    %c96_i32_39 = arith.constant 96 : i32
    %121 = tpu.dynamic_rotate %120 by %c96_i32_39 dim 1 : vector<8x128xf32>, i32 -> vector<8x128xf32>
    %c64_i32_40 = arith.constant 64 : i32
    %122 = tpu.dynamic_rotate %120 by %c64_i32_40 dim 1 : vector<8x128xf32>, i32 -> vector<8x128xf32>
    %c32_i32_41 = arith.constant 32 : i32
    %123 = tpu.dynamic_rotate %120 by %c32_i32_41 dim 1 : vector<8x128xf32>, i32 -> vector<8x128xf32>
    %124 = arith.mulf %121, %103 : vector<8x128xf32>
    %125 = arith.mulf %120, %122 : vector<8x128xf32>
    %126 = arith.addf %124, %125 : vector<8x128xf32>
    %127 = vector.extract_strided_slice %123 {offsets = [0, 0], sizes = [8, 32], strides = [1, 1]} : vector<8x128xf32> to vector<8x32xf32>
    %128 = vector.extract_strided_slice %126 {offsets = [0, 0], sizes = [8, 32], strides = [1, 1]} : vector<8x128xf32> to vector<8x32xf32>
    %129 = math.tanh %128 : vector<8x32xf32>
    %130 = arith.mulf %127, %129 : vector<8x32xf32>
    %131 = vector.extract_strided_slice %7 {offsets = [40, 0], sizes = [8, 128], strides = [1, 1]} : vector<64x128xf32> to vector<8x128xf32>
    %cst_42 = arith.constant dense<0.000000e+00> : vector<8x128xf32>
    %132 = tpu.matmul %130, %1, %cst_42 {dimension_numbers = #tpu.dot_dimension_numbers<[1], [0], [0], [1], [0, 0, 1, 1], [], []>} : vector<8x32xf32>, vector<32x128xf32>, vector<8x128xf32> -> vector<8x128xf32>
    %133 = arith.addf %131, %132 : vector<8x128xf32>
    %134 = arith.negf %133 : vector<8x128xf32>
    %135 = math.exp %134 : vector<8x128xf32>
    %cst_43 = arith.constant 1.000000e+00 : f32
    %136 = vector.broadcast %cst_43 : f32 to vector<8x128xf32>
    %137 = arith.addf %136, %135 : vector<8x128xf32>
    %138 = arith.divf %136, %137 : vector<8x128xf32>
    %cst_44 = arith.constant 2.000000e+00 : f32
    %139 = vector.broadcast %cst_44 : f32 to vector<8x128xf32>
    %140 = arith.mulf %139, %138 : vector<8x128xf32>
    %cst_45 = arith.constant 1.000000e+00 : f32
    %141 = vector.broadcast %cst_45 : f32 to vector<8x128xf32>
    %142 = arith.subf %140, %141 : vector<8x128xf32>
    %143 = arith.select %13, %142, %138 : vector<8x128xi1>, vector<8x128xf32>
    %c96_i32_46 = arith.constant 96 : i32
    %144 = tpu.dynamic_rotate %143 by %c96_i32_46 dim 1 : vector<8x128xf32>, i32 -> vector<8x128xf32>
    %c64_i32_47 = arith.constant 64 : i32
    %145 = tpu.dynamic_rotate %143 by %c64_i32_47 dim 1 : vector<8x128xf32>, i32 -> vector<8x128xf32>
    %c32_i32_48 = arith.constant 32 : i32
    %146 = tpu.dynamic_rotate %143 by %c32_i32_48 dim 1 : vector<8x128xf32>, i32 -> vector<8x128xf32>
    %147 = arith.mulf %144, %126 : vector<8x128xf32>
    %148 = arith.mulf %143, %145 : vector<8x128xf32>
    %149 = arith.addf %147, %148 : vector<8x128xf32>
    %150 = vector.extract_strided_slice %146 {offsets = [0, 0], sizes = [8, 32], strides = [1, 1]} : vector<8x128xf32> to vector<8x32xf32>
    %151 = vector.extract_strided_slice %149 {offsets = [0, 0], sizes = [8, 32], strides = [1, 1]} : vector<8x128xf32> to vector<8x32xf32>
    %152 = math.tanh %151 : vector<8x32xf32>
    %153 = arith.mulf %150, %152 : vector<8x32xf32>
    %154 = vector.extract_strided_slice %7 {offsets = [48, 0], sizes = [8, 128], strides = [1, 1]} : vector<64x128xf32> to vector<8x128xf32>
    %cst_49 = arith.constant dense<0.000000e+00> : vector<8x128xf32>
    %155 = tpu.matmul %153, %1, %cst_49 {dimension_numbers = #tpu.dot_dimension_numbers<[1], [0], [0], [1], [0, 0, 1, 1], [], []>} : vector<8x32xf32>, vector<32x128xf32>, vector<8x128xf32> -> vector<8x128xf32>
    %156 = arith.addf %154, %155 : vector<8x128xf32>
    %157 = arith.negf %156 : vector<8x128xf32>
    %158 = math.exp %157 : vector<8x128xf32>
    %cst_50 = arith.constant 1.000000e+00 : f32
    %159 = vector.broadcast %cst_50 : f32 to vector<8x128xf32>
    %160 = arith.addf %159, %158 : vector<8x128xf32>
    %161 = arith.divf %159, %160 : vector<8x128xf32>
    %cst_51 = arith.constant 2.000000e+00 : f32
    %162 = vector.broadcast %cst_51 : f32 to vector<8x128xf32>
    %163 = arith.mulf %162, %161 : vector<8x128xf32>
    %cst_52 = arith.constant 1.000000e+00 : f32
    %164 = vector.broadcast %cst_52 : f32 to vector<8x128xf32>
    %165 = arith.subf %163, %164 : vector<8x128xf32>
    %166 = arith.select %13, %165, %161 : vector<8x128xi1>, vector<8x128xf32>
    %c96_i32_53 = arith.constant 96 : i32
    %167 = tpu.dynamic_rotate %166 by %c96_i32_53 dim 1 : vector<8x128xf32>, i32 -> vector<8x128xf32>
    %c64_i32_54 = arith.constant 64 : i32
    %168 = tpu.dynamic_rotate %166 by %c64_i32_54 dim 1 : vector<8x128xf32>, i32 -> vector<8x128xf32>
    %c32_i32_55 = arith.constant 32 : i32
    %169 = tpu.dynamic_rotate %166 by %c32_i32_55 dim 1 : vector<8x128xf32>, i32 -> vector<8x128xf32>
    %170 = arith.mulf %167, %149 : vector<8x128xf32>
    %171 = arith.mulf %166, %168 : vector<8x128xf32>
    %172 = arith.addf %170, %171 : vector<8x128xf32>
    %173 = vector.extract_strided_slice %169 {offsets = [0, 0], sizes = [8, 32], strides = [1, 1]} : vector<8x128xf32> to vector<8x32xf32>
    %174 = vector.extract_strided_slice %172 {offsets = [0, 0], sizes = [8, 32], strides = [1, 1]} : vector<8x128xf32> to vector<8x32xf32>
    %175 = math.tanh %174 : vector<8x32xf32>
    %176 = arith.mulf %173, %175 : vector<8x32xf32>
    %177 = vector.extract_strided_slice %7 {offsets = [56, 0], sizes = [8, 128], strides = [1, 1]} : vector<64x128xf32> to vector<8x128xf32>
    %cst_56 = arith.constant dense<0.000000e+00> : vector<8x128xf32>
    %178 = tpu.matmul %176, %1, %cst_56 {dimension_numbers = #tpu.dot_dimension_numbers<[1], [0], [0], [1], [0, 0, 1, 1], [], []>} : vector<8x32xf32>, vector<32x128xf32>, vector<8x128xf32> -> vector<8x128xf32>
    %179 = arith.addf %177, %178 : vector<8x128xf32>
    %180 = arith.negf %179 : vector<8x128xf32>
    %181 = math.exp %180 : vector<8x128xf32>
    %cst_57 = arith.constant 1.000000e+00 : f32
    %182 = vector.broadcast %cst_57 : f32 to vector<8x128xf32>
    %183 = arith.addf %182, %181 : vector<8x128xf32>
    %184 = arith.divf %182, %183 : vector<8x128xf32>
    %cst_58 = arith.constant 2.000000e+00 : f32
    %185 = vector.broadcast %cst_58 : f32 to vector<8x128xf32>
    %186 = arith.mulf %185, %184 : vector<8x128xf32>
    %cst_59 = arith.constant 1.000000e+00 : f32
    %187 = vector.broadcast %cst_59 : f32 to vector<8x128xf32>
    %188 = arith.subf %186, %187 : vector<8x128xf32>
    %189 = arith.select %13, %188, %184 : vector<8x128xi1>, vector<8x128xf32>
    %c96_i32_60 = arith.constant 96 : i32
    %190 = tpu.dynamic_rotate %189 by %c96_i32_60 dim 1 : vector<8x128xf32>, i32 -> vector<8x128xf32>
    %c64_i32_61 = arith.constant 64 : i32
    %191 = tpu.dynamic_rotate %189 by %c64_i32_61 dim 1 : vector<8x128xf32>, i32 -> vector<8x128xf32>
    %c32_i32_62 = arith.constant 32 : i32
    %192 = tpu.dynamic_rotate %189 by %c32_i32_62 dim 1 : vector<8x128xf32>, i32 -> vector<8x128xf32>
    %193 = arith.mulf %190, %172 : vector<8x128xf32>
    %194 = arith.mulf %189, %191 : vector<8x128xf32>
    %195 = arith.addf %193, %194 : vector<8x128xf32>
    %196 = vector.extract_strided_slice %192 {offsets = [0, 0], sizes = [8, 32], strides = [1, 1]} : vector<8x128xf32> to vector<8x32xf32>
    %197 = vector.extract_strided_slice %195 {offsets = [0, 0], sizes = [8, 32], strides = [1, 1]} : vector<8x128xf32> to vector<8x32xf32>
    %198 = math.tanh %197 : vector<8x32xf32>
    %199 = arith.mulf %196, %198 : vector<8x32xf32>
    %200 = vector.extract_strided_slice %3 {offsets = [0, 0], sizes = [1, 32], strides = [1, 1]} : vector<1x128xf32> to vector<1x32xf32>
    %201 = vector.broadcast %200 : vector<1x32xf32> to vector<8x32xf32>
    %202 = arith.mulf %199, %201 : vector<8x32xf32>
    %cst_63 = arith.constant dense<0.000000e+00> : vector<8xf32>
    %203 = vector.multi_reduction <add>, %202, %cst_63 [1] : vector<8x32xf32> to vector<8xf32>
    %204 = vector.shape_cast %203 : vector<8xf32> to vector<8x1xf32>
    %205 = vector.extract_strided_slice %3 {offsets = [0, 32], sizes = [1, 1], strides = [1, 1]} : vector<1x128xf32> to vector<1x1xf32>
    %206 = vector.broadcast %205 : vector<1x1xf32> to vector<8x1xf32>
    %207 = arith.addf %204, %206 : vector<8x1xf32>
    %c0_64 = arith.constant 0 : index
    %c0_65 = arith.constant 0 : index
    %208 = vector.load %arg3[%c0_64, %c0_65] : memref<8x1xf32, #tpu.memory_space<vmem>>, vector<8x1xf32>
    tpu.vector_store %arg3[%c0_64, %c0_65], %207 {strides = array<i32>} : memref<8x1xf32, #tpu.memory_space<vmem>>, vector<8x1xf32>,
    return
  }
  func.func @transform_0(%arg0: i32) -> (i32, i32) {
    %c0_i32 = arith.constant 0 : i32
    %c0_i32_0 = arith.constant 0 : i32
    %c0_i32_1 = arith.constant 0 : i32
    return %c0_i32, %c0_i32_0 : i32, i32
  }
  func.func @transform_1(%arg0: i32) -> (i32, i32) {
    %c0_i32 = arith.constant 0 : i32
    %c0_i32_0 = arith.constant 0 : i32
    %c0_i32_1 = arith.constant 0 : i32
    return %c0_i32, %c0_i32_0 : i32, i32
  }
  func.func @transform_2(%arg0: i32) -> (i32, i32) {
    %c0_i32 = arith.constant 0 : i32
    %c0_i32_0 = arith.constant 0 : i32
    %c0_i32_1 = arith.constant 0 : i32
    return %c0_i32, %c0_i32_0 : i32, i32
  }
}

</mosaic_0001>

<bundles_post_ra>
// kernel: _lstm_model_forward.1
= control target key start
LH: loop header
LB: loop body
LE: loop exit
PB: predicated region body
PF: predicated region fallthrough
CT: control target
= control target key end

     0   :  { %vm55_vm0 = vcmask 1043456   ;;  %vm30_vm1 = vcmask 31744   ;;  %v1179_v0 = vmov 0.0   ;;  %vm1180_vm2 = vmmov 0   ;;  %s1181_s25 = smov 32   ;;  %s1182_s26 = smov 96   ;;  %s1419_s1 = inlined_call_operand.vmem [shape: f32[48,128], index: 1, kind: input, shape index: {}]   ;;  %s1420_s0 = inlined_call_operand.vmem [shape: f32[64,4], index: 0, kind: input, shape index: {}]   ;;  %s1421_s2 = inlined_call_operand.vmem [shape: f32[8,1], index: 2, kind: output, shape index: {}]  }
   0x1   :  { %1038 = vmatprep.subr.mxu1 %v1179_v0  ;;  %v11_v1 = vld [vmem:[%s1419_s1] sm:$0xf]  ;;  %1046 = vmatprep.mubr.msk.f32.mxu1 %vm1180_vm2, %v1179_v0  ;;  %v19_v4 = vld [vmem:[%s1420_s0 + $0x8] sm:$0xff]  ;;  %v1220_v5 = vld [vmem:[%s1419_s1 + $0x18] sm:$0xff]  ;;  %v164_v18 = vlaneseq  ;;  %s1183_s27 = smov 64   ;;  %vm169_vm6 = vcmask 261120  }
   0x2   :  { %v1206_v2 = vld [vmem:[%s1419_s1 + $0x20] sm:$0xff]  ;;  %1024 = vmatprep.subr.msk.mxu0 %vm55_vm0, %v11_v1  ;;  %v1228_v6 = vld [vmem:[%s1419_s1 + $0x10] sm:$0xff]  ;;  %v1236_v7 = vld [vmem:[%s1419_s1 + $0x8] sm:$0xff]  ;;  %vm935_vm7 = vcmask 7168  }
   0x3   :  { %v18_v3 = vld [vmem:[%s1420_s0] sm:$0xff]  ;;  %1039 = vmatpush3.msra.mxu1 %v1206_v2  ;;  %1025 = vmatpush3.msk.msra.mxu0 %vm55_vm0, %v11_v1  ;;  %v1264_v9 = vld [vmem:[%s1419_s1 + $0x28] ss:$0 sm:$0xff]  ;;  %v165_v19 = vand.u32 127, %v164_v18  ;;  %v20_v40 = vld [vmem:[%s1420_s0 + $0x10] sm:$0xff] }
   0x4   :  { %1026 = vmatprep.mubr.msk.f32.mxu0 %vm30_vm1, %v18_v3  ;;  %1040 = vmatprep.subr.mxu1 %v1179_v0  ;;  %v21_v41 = vld [vmem:[%s1420_s0 + $0x18] sm:$0xff]  ;;  %v22_v44 = vld [vmem:[%s1420_s0 + $0x20] sm:$0xff]  ;;  %v23_v45 = vld [vmem:[%s1420_s0 + $0x28] sm:$0xff] }
   0x5   :  { %1027 = vmatmul.mubr.msk.f32.vlgmr.msra.gmra.mxu0 %vm30_vm1, %v19_v4  ;;  %1041 = vmatpush3.msra.mxu1 %v1220_v5  ;;  %vm166_vm3 = vcmp.ge.s32.totalorder %v165_v19, 64  ;;  %vm167_vm4 = vcmp.lt.s32.totalorder %v165_v19, 96  ;;  %v24_v48 = vld [vmem:[%s1420_s0 + $0x30] sm:$0xff]  ;;  %v25_v49 = vld [vmem:[%s1420_s0 + $0x38] sm:$0xff] }
   0x6   :  { %1060 = vmatprep.subr.mxu0 %v1179_v0  ;;  %1042 = vmatprep.subr.mxu1 %v1179_v0  ;;  %vm1267_vm5 = vmand %vm166_vm3, %vm167_vm4 }
   0x7   :  { %1061 = vmatpush3.msra.mxu0 %v1206_v2  ;;  %1043 = vmatpush3.msra.mxu1 %v1228_v6 }
   0x8   :  { %1062 = vmatprep.subr.mxu0 %v1179_v0  ;;  %1044 = vmatprep.subr.mxu1 %v1179_v0 }
   0x9   :  { %1063 = vmatpush3.msra.mxu0 %v1220_v5  ;;  %1045 = vmatpush3.msra.mxu1 %v1236_v7 }
   0xa   :  { %1064 = vmatprep.subr.mxu0 %v1179_v0  ;;  %1047 = vmatmul.mubr.f32.vlgmr.msra.gmra.mxu1 %v1179_v0 }
   0xb   :  { %1049 = vmatprep.subr.mxu1 %v1179_v0  ;;  %1057 = vmatprep.mubr.msk.f32.mxu1 %vm1180_vm2, %v1179_v0 }
   0xc   :  { %1050 = vmatpush3.msra.mxu1 %v1206_v2  ;;  %1065 = vmatpush3.msra.mxu0 %v1228_v6 }
   0xd   :  { %1051 = vmatprep.subr.mxu1 %v1179_v0  ;;  %1066 = vmatprep.subr.mxu0 %v1179_v0 }
   0xe   :  { %1052 = vmatpush3.msra.mxu1 %v1220_v5  ;;  %1067 = vmatpush3.msra.mxu0 %v1236_v7 }
   0xf   :  { %1053 = vmatprep.subr.mxu1 %v1179_v0  ;;  %1082 = vmatprep.subr.mxu0 %v1179_v0 }
  0x10   :  { %1054 = vmatpush3.msra.mxu1 %v1228_v6  ;;  %1029 = vmatprep.mubr.msk.f32.mxu0 %vm30_vm1, %v20_v40 }
  0x11   :  { %1055 = vmatprep.subr.mxu1 %v1179_v0  ;;  %1030 = vmatmul.mubr.msk.f32.gmra.mxu0 %vm30_vm1, %v21_v41 }
  0x12   :  { %1056 = vmatpush3.msra.mxu1 %v1236_v7  ;;  %1032 = vmatprep.mubr.msk.f32.mxu0 %vm30_vm1, %v22_v44 }
  0x13   :  { %1071 = vmatprep.subr.mxu1 %v1179_v0 }
  0x15   :  { %1033 = vmatmul.mubr.msk.f32.gmra.mxu0 %vm30_vm1, %v23_v45 }
  0x16   :  { %1035 = vmatprep.mubr.msk.f32.mxu0 %vm30_vm1, %v24_v48 }
  0x19   :  { %1036 = vmatmul.mubr.msk.f32.gmra.mxu0 %vm30_vm1, %v25_v49 }
  0x1a   :  { %1068 = vmatprep.mubr.msk.f32.mxu0 %vm1180_vm2, %v1179_v0 }
  0xc5   :  { %v1028_v8 = vpop.f32.mrf.mxu0 }
  0xc6   :  { %v131_v33 = vadd.f32 %v1028_v8, %v1264_v9 }
  0xc7   :  { %v125_v10 = vpop.f32.mrf.mxu0 }
  0xc8   :  { %v126_v11 = vadd.f32 %v1264_v9, %v125_v10 }
  0xca   :  { %v239_v12 = vpop.f32.mrf.mxu1 }
  0xcb   :  { %v243_v13 = vadd.f32 %v239_v12, %v126_v11 }
  0xcc   :  { %v1048_v14 = vpop.f32.mrf.mxu1 }
  0xcd   :  { %v951_v15 = vmul.f32 -1.442695, %v243_v13 }
  0xcf   :  { %1131 = vpow2.f32 %v951_v15 }
  0xd1   :  { %v1031_v58 = vpop.f32.mrf.mxu0 }
  0xd3   :  { %v135_v59 = vpop.f32.mrf.mxu0 }
  0xd4   :  { %v136_v1 = vadd.f32 %v1264_v9, %v135_v59 }
  0xd5   :  { %v1330_v60 = vpop.f32.mrf.mxu0 }
  0xd7   :  { %v1332_v61 = vpop.f32.mrf.mxu0 }
  0xd8   :  { %v146_v45 = vadd.f32 %v1264_v9, %v1332_v61 }
  0xd9   :  { %v1334_v62 = vpop.f32.mrf.mxu0 }
  0xdb   :  { %v1336_v63 = vpop.f32.mrf.mxu0 }
  0xdc   :  { %v1132_v16 = vpop.eup %1131 }
  0xdd   :  { %v247_v17 = vadd.f32 1.0, %v1132_v16 }
  0xdf   :  { %1133 = vrcp.f32 %v247_v17 }
  0xec   :  { %v1134_v20 = vpop.eup %1133 }
  0xed   :  { %v250_v21 = vmul.f32 2.0, %v1134_v20 }
  0xef   :  { %v952_v23 = vadd.f32 -1.0, %v250_v21 }
  0xf1   :  { %v252_v24 = vsel %vm1267_vm5, %v952_v23, %v1134_v20 }
  0xf2   :  { %257 = vrot.lane.b32.xlu1 %v252_v24, %s1181_s25  ;;  %253 = vrot.lane.b32.xlu0 %v252_v24, %s1182_s26 }
  0xf6   :  { %255 = vrot.lane.b32.xlu0 %v252_v24, %s1183_s27 }
 0x164   :  { %v254_v25 = vpop.permute.xlu0 %253  ;;  %v258_v31 = vpop.permute.xlu1 %257 }
 0x165   :  { %v259_v27 = vmul.f32 0.0, %v254_v25 }
 0x168   :  { %v256_v26 = vpop.permute.xlu0 %255 }
 0x169   :  { %v260_v28 = vmul.f32 %v256_v26, %v252_v24  ;;  %v141_v26 = vadd.f32 %v1031_v58, %v1264_v9 }
 0x16b   :  { %v261_v29 = vadd.f32 %v260_v28, %v259_v27 }
 0x16d   :  { %1135 = vtanh.f32 %v261_v29 }
 0x17a   :  { %v1136_v30 = vpop.eup %1135 }
 0x17b   :  { %v263_v32 = vmul.f32 %v1136_v30, %v258_v31 }
 0x17d   :  { %1058 = vmatmul.mubr.msk.f32.vlgmr.msra.gmra.mxu1 %vm169_vm6, %v263_v32 }
 0x17e   :  { %1072 = vmatpush3.msra.mxu1 %v1206_v2  ;;  %1079 = vmatprep.mubr.msk.f32.mxu1 %vm1180_vm2, %v1179_v0 }
 0x17f   :  { %1073 = vmatprep.subr.mxu1 %v1179_v0 }
 0x180   :  { %1074 = vmatpush3.msra.mxu1 %v1220_v5 }
 0x181   :  { %1075 = vmatprep.subr.mxu1 %v1179_v0 }
 0x182   :  { %1076 = vmatpush3.msra.mxu1 %v1228_v6 }
 0x183   :  { %1077 = vmatprep.subr.mxu1 %v1179_v0 }
 0x184   :  { %1078 = vmatpush3.msra.mxu1 %v1236_v7 }
 0x185   :  { %1093 = vmatprep.subr.mxu1 %v1179_v0 }
 0x23d   :  { %v333_v34 = vpop.f32.mrf.mxu1 }
 0x23e   :  { %v337_v35 = vadd.f32 %v333_v34, %v131_v33 }
 0x23f   :  { %v1059_v36 = vpop.f32.mrf.mxu1 }
 0x240   :  { %v954_v37 = vmul.f32 -1.442695, %v337_v35 }
 0x242   :  { %1137 = vpow2.f32 %v954_v37 }
 0x24f   :  { %v1138_v38 = vpop.eup %1137 }
 0x250   :  { %v341_v39 = vadd.f32 1.0, %v1138_v38 }
 0x252   :  { %1139 = vrcp.f32 %v341_v39 }
 0x25f   :  { %v1140_v42 = vpop.eup %1139 }
 0x260   :  { %v344_v43 = vmul.f32 2.0, %v1140_v42 }
 0x262   :  { %v955_v46 = vadd.f32 -1.0, %v344_v43 }
 0x264   :  { %v346_v47 = vsel %vm1267_vm5, %v955_v46, %v1140_v42 }
 0x265   :  { %349 = vrot.lane.b32.xlu0 %v346_v47, %s1183_s27  ;;  %347 = vrot.lane.b32.xlu1 %v346_v47, %s1182_s26 }
 0x269   :  { %351 = vrot.lane.b32.xlu1 %v346_v47, %s1181_s25 }
 0x2d7   :  { %v350_v50 = vpop.permute.xlu0 %349  ;;  %v348_v51 = vpop.permute.xlu1 %347 }
 0x2d8   :  { %v354_v52 = vmul.f32 %v350_v50, %v346_v47  ;;  %v353_v53 = vmul.f32 %v348_v51, %v261_v29 }
 0x2da   :  { %v355_v54 = vadd.f32 %v354_v52, %v353_v53 }
 0x2db   :  { %v352_v56 = vpop.permute.xlu1 %351 }
 0x2dc   :  { %1141 = vtanh.f32 %v355_v54 }
 0x2e9   :  { %v1142_v55 = vpop.eup %1141 }
 0x2ea   :  { %v357_v57 = vmul.f32 %v1142_v55, %v352_v56 }
 0x2ec   :  { %1069 = vmatmul.mubr.msk.f32.vlgmr.msra.gmra.mxu0 %vm169_vm6, %v357_v57 }
 0x2ed   :  { %1083 = vmatpush3.msra.mxu0 %v1206_v2  ;;  %1090 = vmatprep.mubr.msk.f32.mxu0 %vm1180_vm2, %v1179_v0 }
 0x2ee   :  { %1084 = vmatprep.subr.mxu0 %v1179_v0 }
 0x2ef   :  { %1085 = vmatpush3.msra.mxu0 %v1220_v5 }
 0x2f0   :  { %1086 = vmatprep.subr.mxu0 %v1179_v0 }
 0x2f1   :  { %1087 = vmatpush3.msra.mxu0 %v1228_v6 }
 0x2f2   :  { %1088 = vmatprep.subr.mxu0 %v1179_v0 }
 0x2f3   :  { %1089 = vmatpush3.msra.mxu0 %v1236_v7 }
 0x2f4   :  { %1104 = vmatprep.subr.mxu0 %v1179_v0 }
 0x3ac   :  { %v427_v3 = vpop.f32.mrf.mxu0 }
 0x3ad   :  { %v431_v4 = vadd.f32 %v427_v3, %v136_v1 }
 0x3ae   :  { %v1070_v8 = vpop.f32.mrf.mxu0 }
 0x3af   :  { %v957_v10 = vmul.f32 -1.442695, %v431_v4  ;;  %v151_v8 = vadd.f32 %v1330_v60, %v1264_v9 }
 0x3b1   :  { %1143 = vpow2.f32 %v957_v10 }
 0x3be   :  { %v1144_v11 = vpop.eup %1143 }
 0x3bf   :  { %v435_v12 = vadd.f32 1.0, %v1144_v11 }
 0x3c1   :  { %1145 = vrcp.f32 %v435_v12 }
 0x3ce   :  { %v1146_v13 = vpop.eup %1145 }
 0x3cf   :  { %v438_v14 = vmul.f32 2.0, %v1146_v13 }
 0x3d1   :  { %v958_v15 = vadd.f32 -1.0, %v438_v14 }
 0x3d3   :  { %v440_v16 = vsel %vm1267_vm5, %v958_v15, %v1146_v13 }
 0x3d4   :  { %443 = vrot.lane.b32.xlu1 %v440_v16, %s1183_s27  ;;  %441 = vrot.lane.b32.xlu0 %v440_v16, %s1182_s26 }
 0x3d8   :  { %445 = vrot.lane.b32.xlu0 %v440_v16, %s1181_s25 }
 0x446   :  { %v444_v17 = vpop.permute.xlu1 %443  ;;  %v442_v18 = vpop.permute.xlu0 %441 }
 0x447   :  { %v448_v19 = vmul.f32 %v444_v17, %v440_v16  ;;  %v447_v20 = vmul.f32 %v442_v18, %v355_v54 }
 0x449   :  { %v449_v21 = vadd.f32 %v448_v19, %v447_v20 }
 0x44a   :  { %v446_v24 = vpop.permute.xlu0 %445 }
 0x44b   :  { %1147 = vtanh.f32 %v449_v21 }
 0x458   :  { %v1148_v23 = vpop.eup %1147 }
 0x459   :  { %v451_v25 = vmul.f32 %v1148_v23, %v446_v24  ;;  %v156_v23 = vadd.f32 %v1264_v9, %v1336_v63 }
 0x45b   :  { %1080 = vmatmul.mubr.msk.f32.vlgmr.msra.gmra.mxu1 %vm169_vm6, %v451_v25 }
 0x45c   :  { %1094 = vmatpush3.msra.mxu1 %v1206_v2  ;;  %1101 = vmatprep.mubr.msk.f32.mxu1 %vm1180_vm2, %v1179_v0 }
 0x45d   :  { %1095 = vmatprep.subr.mxu1 %v1179_v0 }
 0x45e   :  { %1096 = vmatpush3.msra.mxu1 %v1220_v5 }
 0x45f   :  { %1097 = vmatprep.subr.mxu1 %v1179_v0 }
 0x460   :  { %1098 = vmatpush3.msra.mxu1 %v1228_v6 }
 0x461   :  { %1099 = vmatprep.subr.mxu1 %v1179_v0 }
 0x462   :  { %1100 = vmatpush3.msra.mxu1 %v1236_v7 }
 0x463   :  { %1115 = vmatprep.subr.mxu1 %v1179_v0 }
 0x51b   :  { %v521_v27 = vpop.f32.mrf.mxu1 }
 0x51c   :  { %v525_v28 = vadd.f32 %v521_v27, %v141_v26 }
 0x51d   :  { %v1081_v29 = vpop.f32.mrf.mxu1 }
 0x51e   :  { %v960_v30 = vmul.f32 -1.442695, %v525_v28 }
 0x520   :  { %1149 = vpow2.f32 %v960_v30 }
 0x52d   :  { %v1150_v31 = vpop.eup %1149 }
 0x52e   :  { %v529_v32 = vadd.f32 1.0, %v1150_v31 }
 0x530   :  { %1151 = vrcp.f32 %v529_v32 }
 0x53d   :  { %v1152_v33 = vpop.eup %1151 }
 0x53e   :  { %v532_v34 = vmul.f32 2.0, %v1152_v33 }
 0x540   :  { %v961_v35 = vadd.f32 -1.0, %v532_v34 }
 0x542   :  { %v534_v36 = vsel %vm1267_vm5, %v961_v35, %v1152_v33 }
 0x543   :  { %537 = vrot.lane.b32.xlu0 %v534_v36, %s1183_s27  ;;  %535 = vrot.lane.b32.xlu1 %v534_v36, %s1182_s26 }
 0x547   :  { %539 = vrot.lane.b32.xlu1 %v534_v36, %s1181_s25 }
 0x5b5   :  { %v538_v37 = vpop.permute.xlu0 %537  ;;  %v536_v38 = vpop.permute.xlu1 %535 }
 0x5b6   :  { %v542_v39 = vmul.f32 %v538_v37, %v534_v36  ;;  %v541_v40 = vmul.f32 %v536_v38, %v449_v21 }
 0x5b8   :  { %v543_v41 = vadd.f32 %v542_v39, %v541_v40 }
 0x5b9   :  { %v540_v43 = vpop.permute.xlu1 %539 }
 0x5ba   :  { %1153 = vtanh.f32 %v543_v41 }
 0x5c7   :  { %v1154_v42 = vpop.eup %1153 }
 0x5c8   :  { %v545_v44 = vmul.f32 %v1154_v42, %v540_v43 }
 0x5ca   :  { %1091 = vmatmul.mubr.msk.f32.vlgmr.msra.gmra.mxu0 %vm169_vm6, %v545_v44 }
 0x5cb   :  { %1105 = vmatpush3.msra.mxu0 %v1206_v2  ;;  %1112 = vmatprep.mubr.msk.f32.mxu0 %vm1180_vm2, %v1179_v0 }
 0x5cc   :  { %1106 = vmatprep.subr.mxu0 %v1179_v0 }
 0x5cd   :  { %1107 = vmatpush3.msra.mxu0 %v1220_v5 }
 0x5ce   :  { %1108 = vmatprep.subr.mxu0 %v1179_v0 }
 0x5cf   :  { %1109 = vmatpush3.msra.mxu0 %v1228_v6 }
 0x5d0   :  { %1110 = vmatprep.subr.mxu0 %v1179_v0 }
 0x5d1   :  { %1111 = vmatpush3.msra.mxu0 %v1236_v7 }
 0x68a   :  { %v615_v46 = vpop.f32.mrf.mxu0 }
 0x68b   :  { %v619_v47 = vadd.f32 %v615_v46, %v146_v45 }
 0x68c   :  { %v1092_v48 = vpop.f32.mrf.mxu0 }
 0x68d   :  { %v963_v49 = vmul.f32 -1.442695, %v619_v47 }
 0x68f   :  { %1155 = vpow2.f32 %v963_v49 }
 0x69c   :  { %v1156_v50 = vpop.eup %1155 }
 0x69d   :  { %v623_v51 = vadd.f32 1.0, %v1156_v50 }
 0x69f   :  { %1157 = vrcp.f32 %v623_v51 }
 0x6ac   :  { %v1158_v52 = vpop.eup %1157 }
 0x6ad   :  { %v626_v53 = vmul.f32 2.0, %v1158_v52 }
 0x6af   :  { %v964_v54 = vadd.f32 -1.0, %v626_v53 }
 0x6b1   :  { %v628_v55 = vsel %vm1267_vm5, %v964_v54, %v1158_v52 }
 0x6b2   :  { %631 = vrot.lane.b32.xlu1 %v628_v55, %s1183_s27  ;;  %629 = vrot.lane.b32.xlu0 %v628_v55, %s1182_s26 }
 0x6b6   :  { %633 = vrot.lane.b32.xlu0 %v628_v55, %s1181_s25 }
 0x724   :  { %v632_v56 = vpop.permute.xlu1 %631  ;;  %v630_v57 = vpop.permute.xlu0 %629 }
 0x725   :  { %v636_v58 = vmul.f32 %v632_v56, %v628_v55  ;;  %v635_v59 = vmul.f32 %v630_v57, %v543_v41  ;;  %v161_v41 = vadd.f32 %v1334_v62, %v1264_v9  ;;  %v974_v57 = vld [vmem:[%s1419_s1 + $0x29] ss:$0 sm:$0xff] }
 0x727   :  { %v637_v61 = vadd.f32 %v636_v58, %v635_v59 }
 0x728   :  { %v634_v3 = vpop.permute.xlu0 %633 }
 0x729   :  { %1159 = vtanh.f32 %v637_v61 }
 0x736   :  { %v1160_v1 = vpop.eup %1159 }
 0x737   :  { %v639_v4 = vmul.f32 %v1160_v1, %v634_v3 }
 0x739   :  { %1102 = vmatmul.mubr.msk.f32.vlgmr.msra.gmra.mxu1 %vm169_vm6, %v639_v4 }
 0x73a   :  { %1116 = vmatpush3.msra.mxu1 %v1206_v2  ;;  %1123 = vmatprep.mubr.msk.f32.mxu1 %vm1180_vm2, %v1179_v0 }
 0x73b   :  { %1117 = vmatprep.subr.mxu1 %v1179_v0 }
 0x73c   :  { %1118 = vmatpush3.msra.mxu1 %v1220_v5 }
 0x73d   :  { %1119 = vmatprep.subr.mxu1 %v1179_v0 }
 0x73e   :  { %1120 = vmatpush3.msra.mxu1 %v1228_v6 }
 0x73f   :  { %1121 = vmatprep.subr.mxu1 %v1179_v0 }
 0x740   :  { %1122 = vmatpush3.msra.mxu1 %v1236_v7 }
 0x7f9   :  { %v709_v10 = vpop.f32.mrf.mxu1 }
 0x7fa   :  { %v713_v2 = vadd.f32 %v709_v10, %v151_v8 }
 0x7fb   :  { %v1103_v11 = vpop.f32.mrf.mxu1 }
 0x7fc   :  { %v966_v12 = vmul.f32 -1.442695, %v713_v2 }
 0x7fe   :  { %1161 = vpow2.f32 %v966_v12 }
 0x80b   :  { %v1162_v13 = vpop.eup %1161 }
 0x80c   :  { %v717_v14 = vadd.f32 1.0, %v1162_v13 }
 0x80e   :  { %1163 = vrcp.f32 %v717_v14 }
 0x81b   :  { %v1164_v5 = vpop.eup %1163 }
 0x81c   :  { %v720_v15 = vmul.f32 2.0, %v1164_v5 }
 0x81e   :  { %v967_v16 = vadd.f32 -1.0, %v720_v15 }
 0x820   :  { %v722_v6 = vsel %vm1267_vm5, %v967_v16, %v1164_v5 }
 0x821   :  { %725 = vrot.lane.b32.xlu0 %v722_v6, %s1183_s27  ;;  %723 = vrot.lane.b32.xlu1 %v722_v6, %s1182_s26 }
 0x825   :  { %727 = vrot.lane.b32.xlu1 %v722_v6, %s1181_s25 }
 0x893   :  { %v726_v0 = vpop.permute.xlu0 %725  ;;  %v724_v7 = vpop.permute.xlu1 %723 }
 0x894   :  { %v730_v60 = vmul.f32 %v726_v0, %v722_v6  ;;  %v729_v17 = vmul.f32 %v724_v7, %v637_v61 }
 0x896   :  { %v731_v18 = vadd.f32 %v730_v60, %v729_v17 }
 0x897   :  { %v728_v20 = vpop.permute.xlu1 %727 }
 0x898   :  { %1165 = vtanh.f32 %v731_v18 }
 0x8a5   :  { %v1166_v19 = vpop.eup %1165 }
 0x8a6   :  { %v733_v21 = vmul.f32 %v1166_v19, %v728_v20 }
 0x8a8   :  { %1113 = vmatmul.mubr.msk.f32.vlgmr.msra.gmra.mxu0 %vm169_vm6, %v733_v21 }
 0x968   :  { %v803_v24 = vpop.f32.mrf.mxu0 }
 0x969   :  { %v807_v25 = vadd.f32 %v803_v24, %v156_v23 }
 0x96a   :  { %v1114_v26 = vpop.f32.mrf.mxu0 }
 0x96b   :  { %v969_v27 = vmul.f32 -1.442695, %v807_v25 }
 0x96d   :  { %1167 = vpow2.f32 %v969_v27 }
 0x97a   :  { %v1168_v28 = vpop.eup %1167 }
 0x97b   :  { %v811_v29 = vadd.f32 1.0, %v1168_v28 }
 0x97d   :  { %1169 = vrcp.f32 %v811_v29 }
 0x98a   :  { %v1170_v30 = vpop.eup %1169 }
 0x98b   :  { %v814_v31 = vmul.f32 2.0, %v1170_v30 }
 0x98d   :  { %v970_v32 = vadd.f32 -1.0, %v814_v31 }
 0x98f   :  { %v816_v33 = vsel %vm1267_vm5, %v970_v32, %v1170_v30 }
 0x990   :  { %819 = vrot.lane.b32.xlu1 %v816_v33, %s1183_s27  ;;  %817 = vrot.lane.b32.xlu0 %v816_v33, %s1182_s26 }
 0x994   :  { %821 = vrot.lane.b32.xlu0 %v816_v33, %s1181_s25 }
 0xa02   :  { %v820_v63 = vpop.permute.xlu1 %819  ;;  %v818_v34 = vpop.permute.xlu0 %817 }
 0xa03   :  { %v824_v35 = vmul.f32 %v820_v63, %v816_v33  ;;  %v823_v36 = vmul.f32 %v818_v34, %v731_v18 }
 0xa05   :  { %v825_v37 = vadd.f32 %v824_v35, %v823_v36 }
 0xa06   :  { %v822_v39 = vpop.permute.xlu0 %821 }
 0xa07   :  { %1171 = vtanh.f32 %v825_v37 }
 0xa14   :  { %v1172_v38 = vpop.eup %1171 }
 0xa15   :  { %v827_v40 = vmul.f32 %v1172_v38, %v822_v39 }
 0xa17   :  { %1124 = vmatmul.mubr.msk.f32.vlgmr.msra.gmra.mxu1 %vm169_vm6, %v827_v40 }
 0xad7   :  { %v897_v42 = vpop.f32.mrf.mxu1 }
 0xad8   :  { %v901_v43 = vadd.f32 %v897_v42, %v161_v41 }
 0xad9   :  { %v1125_v44 = vpop.f32.mrf.mxu1 }
 0xada   :  { %v972_v45 = vmul.f32 -1.442695, %v901_v43 }
 0xadc   :  { %1173 = vpow2.f32 %v972_v45 }
 0xae9   :  { %v1174_v46 = vpop.eup %1173 }
 0xaea   :  { %v905_v47 = vadd.f32 1.0, %v1174_v46 }
 0xaec   :  { %1175 = vrcp.f32 %v905_v47 }
 0xaf9   :  { %v1176_v48 = vpop.eup %1175 }
 0xafa   :  { %v908_v49 = vmul.f32 2.0, %v1176_v48 }
 0xafc   :  { %v973_v50 = vadd.f32 -1.0, %v908_v49 }
 0xafe   :  { %v910_v51 = vsel %vm1267_vm5, %v973_v50, %v1176_v48 }
 0xaff   :  { %913 = vrot.lane.b32.xlu0 %v910_v51, %s1183_s27  ;;  %911 = vrot.lane.b32.xlu1 %v910_v51, %s1182_s26 }
 0xb03   :  { %915 = vrot.lane.b32.xlu1 %v910_v51, %s1181_s25 }
 0xb71   :  { %v914_v9 = vpop.permute.xlu0 %913  ;;  %v912_v62 = vpop.permute.xlu1 %911 }
 0xb72   :  { %v918_v52 = vmul.f32 %v914_v9, %v910_v51  ;;  %v917_v53 = vmul.f32 %v912_v62, %v825_v37 }
 0xb74   :  { %v919_v54 = vadd.f32 %v918_v52, %v917_v53 }
 0xb75   :  { %v916_v56 = vpop.permute.xlu1 %915 }
 0xb76   :  { %1177 = vtanh.f32 %v919_v54 }
 0xb83   :  { %v1178_v55 = vpop.eup %1177 }
 0xb84   :  { %v921_v22 = vmul.f32 %v1178_v55, %v916_v56 }
 0xb86   :  { %v926_v58 = vmul.f32 %v974_v57, %v921_v22 }
 0xb88   :  { %v927_v59 = vsel %vm169_vm6, %v926_v58, 0.0 }
 0xb89   :  { %928 = vadd.xlane.f32.xlu0 %v927_v59 }
 0xc12   :  { %v929_v61 = vpop.xlane.xlu0 %928 }
 0xc13   :  { %v930_v1 = vadd.f32 %v974_v57, %v929_v61 }
 0xc15   :  { %932 = vrot.lane.b32.xlu1 %v930_v1, %s1182_s26 }
 0xc87   :  { %v933_v3 = vpop.permute.xlu1 %932 }
 0xc88   :  { %936 = vst.msk [vmem:[%s1421_s2] sm:$0xff] %vm935_vm7, %v933_v3 }

</bundles_post_ra>
